<compile_context>
chip_gen: v6e
topology: v6e:2x2x1
jax: 0.10.0
libtpu: 0.0.40
codegen_flags: <defaults>
</compile_context>

<pallas_src>
import functools

import jax
import jax.numpy as jnp
from jax.experimental import pallas as pl
from jax.experimental.pallas import tpu as pltpu


def _round_up(x, m):
    return ((x + m - 1) // m) * m


def _mlp_tail(x_cat, w1_ref, b1_ref, w2_ref, b2_ref, w3_ref, b3_ref, o_ref):
    """Shared fused MLP tail. x_cat: (bt, S+A) f32; writes a (1, bt) sigmoid row."""
    h1 = jnp.dot(x_cat, w1_ref[...], preferred_element_type=jnp.float32)
    h1 = jnp.maximum(h1 + b1_ref[...], 0.0)                         # ReLU
    h2 = jnp.dot(h1, w2_ref[...], preferred_element_type=jnp.float32)
    h2 = jnp.maximum(h2 + b2_ref[...], 0.0)                         # ReLU
    # Final (H -> 1) layer as (1,H) x (bt,H) contraction over H -> lane-dense
    # (1, bt) row instead of a sublane-major (bt, 1) column.
    z = jax.lax.dot_general(w3_ref[...], h2,
                            dimension_numbers=(((1,), (1,)), ((), ())),
                            preferred_element_type=jnp.float32)     # (1, bt)
    z = z + b3_ref[0, 0]
    # Sigmoid: exp + approx reciprocal both land on the (otherwise idle) EUP slot.
    sig = pl.reciprocal(1.0 + jnp.exp(-z), approx=True)
    o_ref[0] = sig                                                  # (1, bt) row


def _disc_kernel_discrete(states_ref, act_ref, w1_ref, b1_ref, w2_ref, b2_ref,
                          w3_ref, b3_ref, o_ref):
    """Discrete-action path: one-hot encoding fused in-kernel, then lane-concat."""
    s = states_ref[...]                                             # (bt, S) f32
    a_ids = act_ref[...]                                            # (bt, 1) int32
    state_dim = s.shape[1]
    a_dim = w1_ref.shape[0] - state_dim
    col = jax.lax.broadcasted_iota(jnp.int32, (s.shape[0], a_dim), 1)
    onehot = (col == a_ids).astype(jnp.float32)                     # (bt, A)
    x_cat = jnp.concatenate([s, onehot], axis=-1)                   # (bt, S+A)
    _mlp_tail(x_cat, w1_ref, b1_ref, w2_ref, b2_ref, w3_ref, b3_ref, o_ref)


def _disc_kernel_continuous(states_ref, act_ref, w1_ref, b1_ref, w2_ref, b2_ref,
                            w3_ref, b3_ref, o_ref):
    """Continuous-action path: action features already float, just lane-concat."""
    x_cat = jnp.concatenate([states_ref[...], act_ref[...]], axis=-1)
    _mlp_tail(x_cat, w1_ref, b1_ref, w2_ref, b2_ref, w3_ref, b3_ref, o_ref)


def discriminator_forward(states, actions, params, *, action_dim, b_tile=2048):
    """Forward pass matching the PyTorch Discriminator.forward semantics.

    Weights are stored as (in_features, out_features) so y = x @ W + b matches
    torch's x @ W.T with W of shape (out, in).
    """
    states = states.astype(jnp.float32)
    w1, b1, w2, b2, w3, b3 = params
    state_dim = states.shape[-1]
    d_in, H = w1.shape

    b1_row = b1.reshape(1, H).astype(jnp.float32)
    b2_row = b2.reshape(1, H).astype(jnp.float32)
    w3_row = w3.reshape(1, H).astype(jnp.float32)
    b3_s = b3.reshape(1, 1).astype(jnp.float32)                     # scalar -> SMEM

    discrete = actions.ndim == 1
    if discrete:
        assert d_in == state_dim + action_dim
        act = actions.astype(jnp.int32).reshape(-1, 1)
        kernel = _disc_kernel_discrete
    else:
        act = actions.astype(jnp.float32)
        assert d_in == state_dim + act.shape[-1]
        kernel = _disc_kernel_continuous
    act_cols = act.shape[-1]

    # Batch tiling: big tiles to amortize per-grid-step overhead, but >= 2 grid
    # steps when the batch allows it (v7x megacore). No input padding: the
    # ragged last block is handled by Pallas' boundary padding; bogus rows only
    # feed output lanes that are sliced off below.
    B = states.shape[0]
    bt = max(8, min(_round_up(b_tile, 8), _round_up(B, 8)))
    if B > 8 and pl.cdiv(B, bt) < 2:
        bt = _round_up(pl.cdiv(B, 2), 8)
    grid_b = pl.cdiv(B, bt)

    def batch_spec(cols):
        return pl.BlockSpec((bt, cols), lambda i: (i, 0))

    def const_spec(shape):
        return pl.BlockSpec(shape, lambda i: (0, 0))

    out = pl.pallas_call(
        kernel,
        out_shape=jax.ShapeDtypeStruct((grid_b, 1, bt), jnp.float32),
        grid=(grid_b,),
        in_specs=[
            batch_spec(state_dim),                           # states  (streamed)
            batch_spec(act_cols),                            # actions (streamed)
            const_spec((d_in, H)),                           # w1      (resident)
            const_spec((1, H)),                              # b1
            const_spec((H, H)),                              # w2
            const_spec((1, H)),                              # b2
            const_spec((1, H)),                              # w3 row
            pl.BlockSpec(memory_space=pltpu.MemorySpace.SMEM),  # b3 scalar
        ],
        out_specs=pl.BlockSpec((1, 1, bt), lambda i: (i, 0, 0)),  # lane-dense row
        compiler_params=pltpu.CompilerParams(
            dimension_semantics=("parallel",)),              # megacore on v7x
    )(states, act, w1.astype(jnp.float32), b1_row, w2.astype(jnp.float32),
      b2_row, w3_row, b3_s)

    return out.reshape(-1)[:B].reshape(B, 1)


def discriminator_reward(states, actions, params, *, action_dim, eps=1e-8):
    """GAIL reward: log(D) - log(1 - D), computed from the Pallas forward."""
    d = discriminator_forward(states, actions, params, action_dim=action_dim)
    return (jnp.log(d + eps) - jnp.log(1.0 - d + eps)).squeeze(-1)


def init_params(key, state_dim, action_dim, hidden_dim):
    """Deterministic init matching nn.Linear's U(-1/sqrt(fan_in), 1/sqrt(fan_in))."""
    d_in = state_dim + action_dim
    keys = jax.random.split(key, 6)

    def lin(kw, kb, fan_in, fan_out):
        bound = 1.0 / jnp.sqrt(float(fan_in))
        w = jax.random.uniform(kw, (fan_in, fan_out), jnp.float32, -bound, bound)
        b = jax.random.uniform(kb, (1, fan_out), jnp.float32, -bound, bound)
        return w, b

    w1, b1 = lin(keys[0], keys[1], d_in, hidden_dim)
    w2, b2 = lin(keys[2], keys[3], hidden_dim, hidden_dim)
    w3, b3 = lin(keys[4], keys[5], hidden_dim, 1)
    return (w1, b1, w2, b2, w3, b3)


if __name__ == "__main__":
    state_dim, action_dim, hidden_dim = 12, 4, 128
    batch = 16   # with the >=2-step rule this becomes bt=8, grid=(2,)

    key = jax.random.PRNGKey(0)
    k_params, k_states, k_actions = jax.random.split(key, 3)

    params = init_params(k_params, state_dim, action_dim, hidden_dim)
    states = jax.random.normal(k_states, (batch, state_dim), dtype=jnp.float32)
    actions = jax.random.randint(k_actions, (batch,), 0, action_dim)  # discrete

    # Reference (plain JAX) for the fused kernel semantics.
    a_oh = jax.nn.one_hot(actions, action_dim, dtype=jnp.float32)
    x = jnp.concatenate([states, a_oh], axis=-1)
    w1, b1, w2, b2, w3, b3 = params
    h = jnp.maximum(x @ w1 + b1, 0.0)
    h = jnp.maximum(h @ w2 + b2, 0.0)
    ref = jax.nn.sigmoid(h @ w3 + b3)

    fwd = jax.jit(functools.partial(discriminator_forward, action_dim=action_dim))

    # 1) Discrete-action path (in-kernel one-hot, 2-step grid).
    d_values = fwd(states, actions, params)
    jax.block_until_ready(d_values)
    assert d_values.shape == (batch, 1)
    assert jnp.allclose(d_values, ref, atol=2e-3), "mismatch vs. reference (discrete)"

    # 2) Continuous-action path (2-D float actions).
    d_cont = fwd(states, a_oh, params)
    jax.block_until_ready(d_cont)
    assert jnp.allclose(d_cont, ref, atol=2e-3), "mismatch vs. reference (continuous)"

    # 3) Ragged batch (B not a multiple of the tile): exercises the no-pad path.
    Br = 13
    d_rag = fwd(states[:Br], actions[:Br], params)
    jax.block_until_ready(d_rag)
    assert d_rag.shape == (Br, 1)
    assert jnp.allclose(d_rag, ref[:Br], atol=2e-3), "mismatch vs. reference (ragged)"

    print("KERNEL_OK")
</pallas_src>

<mosaic_0001>
module attributes {stable_mosaic.version = 11 : i64} {
  func.func @_disc_kernel_discrete(%arg0: i32, %arg1: memref<8x12xf32, #tpu.memory_space<vmem>>, %arg2: memref<8x1xi32, #tpu.memory_space<vmem>>, %arg3: memref<16x128xf32, #tpu.memory_space<vmem>>, %arg4: memref<1x128xf32, #tpu.memory_space<vmem>>, %arg5: memref<128x128xf32, #tpu.memory_space<vmem>>, %arg6: memref<1x128xf32, #tpu.memory_space<vmem>>, %arg7: memref<1x128xf32, #tpu.memory_space<vmem>>, %arg8: memref<1x1xf32, #tpu.memory_space<smem>>, %arg9: memref<1x1x8xf32, #tpu.memory_space<vmem>>) attributes {dimension_semantics = [#tpu.dimension_semantics<parallel>], iteration_bounds = array<i64: 2>, scalar_prefetch = 0 : i64, scratch_operands = 0 : i64, tpu.core_type = #tpu.core_type<tc>, window_params = [{transform_indices = @transform_0, window_bounds = array<i64: 8, 12>}, {transform_indices = @transform_1, window_bounds = array<i64: 8, 1>}, {pipeline_mode = #tpu.pipeline_mode<synchronous>, transform_indices = @transform_2, window_bounds = array<i64: 16, 128>}, {pipeline_mode = #tpu.pipeline_mode<synchronous>, transform_indices = @transform_3, window_bounds = array<i64: 1, 128>}, {pipeline_mode = #tpu.pipeline_mode<synchronous>, transform_indices = @transform_4, window_bounds = array<i64: 128, 128>}, {pipeline_mode = #tpu.pipeline_mode<synchronous>, transform_indices = @transform_5, window_bounds = array<i64: 1, 128>}, {pipeline_mode = #tpu.pipeline_mode<synchronous>, transform_indices = @transform_6, window_bounds = array<i64: 1, 128>}, {transform_indices = @transform_7, window_bounds = array<i64: 1, 1>}, {transform_indices = @transform_8, window_bounds = array<i64: 1, 1, 8>}]} {
    %c0 = arith.constant 0 : index
    %c0_0 = arith.constant 0 : index
    %0 = vector.load %arg1[%c0, %c0_0] : memref<8x12xf32, #tpu.memory_space<vmem>>, vector<8x12xf32>
    %c0_1 = arith.constant 0 : index
    %c0_2 = arith.constant 0 : index
    %1 = vector.load %arg2[%c0_1, %c0_2] : memref<8x1xi32, #tpu.memory_space<vmem>>, vector<8x1xi32>
    %2 = tpu.iota {dimensions = array<i32: 1>} : vector<8x4xi32>
    %3 = vector.broadcast %1 : vector<8x1xi32> to vector<8x4xi32>
    %4 = arith.cmpi eq, %2, %3 : vector<8x4xi32>
    %5 = arith.extui %4 : vector<8x4xi1> to vector<8x4xi32>
    %6 = arith.sitofp %5 : vector<8x4xi32> to vector<8x4xf32>
    %7 = tpu.concatenate %0, %6 in 1 : vector<8x12xf32>, vector<8x4xf32> -> vector<8x16xf32>
    %c0_3 = arith.constant 0 : index
    %c0_4 = arith.constant 0 : index
    %8 = vector.load %arg3[%c0_3, %c0_4] : memref<16x128xf32, #tpu.memory_space<vmem>>, vector<16x128xf32>
    %cst = arith.constant dense<0.000000e+00> : vector<8x128xf32>
    %9 = tpu.matmul %7, %8, %cst {dimension_numbers = #tpu.dot_dimension_numbers<[1], [0], [0], [1], [0, 0, 1, 1], [], []>} : vector<8x16xf32>, vector<16x128xf32>, vector<8x128xf32> -> vector<8x128xf32>
    %c0_5 = arith.constant 0 : index
    %c0_6 = arith.constant 0 : index
    %10 = vector.load %arg4[%c0_5, %c0_6] : memref<1x128xf32, #tpu.memory_space<vmem>>, vector<1x128xf32>
    %11 = vector.broadcast %10 : vector<1x128xf32> to vector<8x128xf32>
    %12 = arith.addf %9, %11 : vector<8x128xf32>
    %cst_7 = arith.constant 0.000000e+00 : f32
    %13 = vector.broadcast %cst_7 : f32 to vector<8x128xf32>
    %14 = arith.maximumf %12, %13 : vector<8x128xf32>
    %c0_8 = arith.constant 0 : index
    %c0_9 = arith.constant 0 : index
    %15 = vector.load %arg5[%c0_8, %c0_9] : memref<128x128xf32, #tpu.memory_space<vmem>>, vector<128x128xf32>
    %cst_10 = arith.constant dense<0.000000e+00> : vector<8x128xf32>
    %16 = tpu.matmul %14, %15, %cst_10 {dimension_numbers = #tpu.dot_dimension_numbers<[1], [0], [0], [1], [0, 0, 1, 1], [], []>} : vector<8x128xf32>, vector<128x128xf32>, vector<8x128xf32> -> vector<8x128xf32>
    %c0_11 = arith.constant 0 : index
    %c0_12 = arith.constant 0 : index
    %17 = vector.load %arg6[%c0_11, %c0_12] : memref<1x128xf32, #tpu.memory_space<vmem>>, vector<1x128xf32>
    %18 = vector.broadcast %17 : vector<1x128xf32> to vector<8x128xf32>
    %19 = arith.addf %16, %18 : vector<8x128xf32>
    %cst_13 = arith.constant 0.000000e+00 : f32
    %20 = vector.broadcast %cst_13 : f32 to vector<8x128xf32>
    %21 = arith.maximumf %19, %20 : vector<8x128xf32>
    %c0_14 = arith.constant 0 : index
    %c0_15 = arith.constant 0 : index
    %22 = vector.load %arg7[%c0_14, %c0_15] : memref<1x128xf32, #tpu.memory_space<vmem>>, vector<1x128xf32>
    %cst_16 = arith.constant dense<0.000000e+00> : vector<1x8xf32>
    %23 = tpu.matmul %22, %21, %cst_16 {dimension_numbers = #tpu.dot_dimension_numbers<[1], [1], [0], [0], [0, 0, 1, 0], [], []>} : vector<1x128xf32>, vector<8x128xf32>, vector<1x8xf32> -> vector<1x8xf32>
    %c0_17 = arith.constant 0 : index
    %c0_18 = arith.constant 0 : index
    %24 = memref.load %arg8[%c0_17, %c0_18] : memref<1x1xf32, #tpu.memory_space<smem>>
    %25 = vector.broadcast %24 : f32 to vector<1x8xf32>
    %26 = arith.addf %23, %25 : vector<1x8xf32>
    %cst_19 = arith.constant 0.000000e+00 : f32
    %27 = vector.broadcast %cst_19 : f32 to vector<1x8xf32>
    %28 = arith.subf %27, %26 : vector<1x8xf32>
    %29 = math.exp %28 : vector<1x8xf32>
    %cst_20 = arith.constant 1.000000e+00 : f32
    %30 = vector.broadcast %cst_20 : f32 to vector<1x8xf32>
    %31 = arith.addf %30, %29 : vector<1x8xf32>
    %32 = tpu.reciprocal %31 {approx = true} : vector<1x8xf32> -> vector<1x8xf32>
    %c0_21 = arith.constant 0 : index
    %c0_22 = arith.constant 0 : index
    %c0_23 = arith.constant 0 : index
    %33 = vector.load %arg9[%c0_21, %c0_22, %c0_23] : memref<1x1x8xf32, #tpu.memory_space<vmem>>, vector<1x1x8xf32>
    %34 = vector.shape_cast %33 : vector<1x1x8xf32> to vector<1x8xf32>
    %35 = vector.shape_cast %32 : vector<1x8xf32> to vector<1x1x8xf32>
    tpu.vector_store %arg9[%c0_21, %c0_22, %c0_23], %35 {strides = array<i32>} : memref<1x1x8xf32, #tpu.memory_space<vmem>>, vector<1x1x8xf32>,
    return
  }
  func.func @transform_0(%arg0: i32) -> (i32, i32) {
    %c0_i32 = arith.constant 0 : i32
    %c0_i32_0 = arith.constant 0 : i32
    return %arg0, %c0_i32 : i32, i32
  }
  func.func @transform_1(%arg0: i32) -> (i32, i32) {
    %c0_i32 = arith.constant 0 : i32
    %c0_i32_0 = arith.constant 0 : i32
    return %arg0, %c0_i32 : i32, i32
  }
  func.func @transform_2(%arg0: i32) -> (i32, i32) {
    %c0_i32 = arith.constant 0 : i32
    %c0_i32_0 = arith.constant 0 : i32
    %c0_i32_1 = arith.constant 0 : i32
    return %c0_i32, %c0_i32_0 : i32, i32
  }
  func.func @transform_3(%arg0: i32) -> (i32, i32) {
    %c0_i32 = arith.constant 0 : i32
    %c0_i32_0 = arith.constant 0 : i32
    %c0_i32_1 = arith.constant 0 : i32
    return %c0_i32, %c0_i32_0 : i32, i32
  }
  func.func @transform_4(%arg0: i32) -> (i32, i32) {
    %c0_i32 = arith.constant 0 : i32
    %c0_i32_0 = arith.constant 0 : i32
    %c0_i32_1 = arith.constant 0 : i32
    return %c0_i32, %c0_i32_0 : i32, i32
  }
  func.func @transform_5(%arg0: i32) -> (i32, i32) {
    %c0_i32 = arith.constant 0 : i32
    %c0_i32_0 = arith.constant 0 : i32
    %c0_i32_1 = arith.constant 0 : i32
    return %c0_i32, %c0_i32_0 : i32, i32
  }
  func.func @transform_6(%arg0: i32) -> (i32, i32) {
    %c0_i32 = arith.constant 0 : i32
    %c0_i32_0 = arith.constant 0 : i32
    %c0_i32_1 = arith.constant 0 : i32
    return %c0_i32, %c0_i32_0 : i32, i32
  }
  func.func @transform_7(%arg0: i32) -> (i32, i32) {
    %c0_i32 = arith.constant 0 : i32
    %c0_i32_0 = arith.constant 0 : i32
    %c0_i32_1 = arith.constant 0 : i32
    return %c0_i32, %c0_i32_0 : i32, i32
  }
  func.func @transform_8(%arg0: i32) -> (i32, i32, i32) {
    %c0_i32 = arith.constant 0 : i32
    %c0_i32_0 = arith.constant 0 : i32
    %c0_i32_1 = arith.constant 0 : i32
    return %arg0, %c0_i32, %c0_i32_0 : i32, i32, i32
  }
}

</mosaic_0001>

<bundles_post_ra>
// kernel: discriminator_forward.1
= control target key start
LH: loop header
LB: loop body
LE: loop exit
PB: predicated region body
PF: predicated region fallthrough
CT: control target
= control target key end

     0   :  { %s1060_s0 = inlined_call_operand.vmem [shape: f32[16,12], index: 0, kind: input, shape index: {}]   ;;  %s1061_s1 = inlined_call_operand.vmem [shape: s32[16,1], index: 1, kind: input, shape index: {}]   ;;  %s1062_s2 = inlined_call_operand.hbm [shape: f32[16,128], index: 2, kind: input, shape index: {}]   ;;  %s1063_s3 = inlined_call_operand.vmem [shape: f32[1,128], index: 3, kind: input, shape index: {}]   ;;  %s1064_s4 = inlined_call_operand.hbm [shape: f32[128,128], index: 4, kind: input, shape index: {}]   ;;  %s1065_s5 = inlined_call_operand.vmem [shape: f32[1,128], index: 5, kind: input, shape index: {}]   ;;  %s1066_s6 = inlined_call_operand.vmem [shape: f32[1,128], index: 6, kind: input, shape index: {}]   ;;  %s1067_s7 = inlined_call_operand.<no memory space> [shape: f32[1,1], index: 7, kind: input, shape index: {}]   ;;  %s1068_s8 = inlined_call_operand.vmem [shape: f32[2,1,8], index: 8, kind: output, shape index: {}]  }
   0x1   :  { %13 = sst [smem:[#allocation2]] %s1067_s7 }
   0x2   :  { %14 = vsyncpa [#allocation4], 0 }
   0x3   :  { %15 = vsyncpa [#allocation6], 0  ;;  %s952_s29 = smov 0  }
   0x4 LB: > { %s958_s30 = sadd.s32 4294967295, %s894_s29   ;;  %p704_p0 = scmp.ge.s32.totalorder %s894_s29, 1  ;;  %s894_s29 = sphi %s952_s29, %s21_s29  }
   0x5   : > { %p230_p1 = scmp.lt.s32.totalorder %s894_s29, 3  ;;  %s896_s9 = smov [#allocation3]  }
   0x6   : > { %s242_s7 = sshll.u32 %s896_s9, 4  ;;  %p803_p3 = scmp.eq.s32.totalorder %s958_s30, 0  ;;  %s243_s7 = int_to_ptr.vmem [resolvable:$true] %s242_s7 }
   0x7   : > { %p962_p2 = pnand %p704_p0, %p230_p1  ;;  %s897_s11 = smov [#allocation5]  }
   0x8   : > { %s258_s12 = sshll.u32 %s897_s11, 4  ;;  %s839_s14 = scalar_lea.vmem %s243_s7, 256  ;;  %s259_s12 = int_to_ptr.vmem [resolvable:$true] %s258_s12 }
   0x9   : > { %p796_p4 = pneg %p962_p2  ;;  %p840_p7 = scmp.ne.s32.totalorder %s243_s7, %s839_s14 }
   0xa   : > { %p847_p10 = scmp.lt.s32.totalorder %s243_s7, %s243_s7  ;;  %p848_p11 = scmp.lt.s32.totalorder %s839_s14, %s839_s14 }
   0xb   : > { %p971_p5 = pnand %p803_p3, %p796_p4 }
   0xc   : > { %p849_p12 = por %p848_p11, %p847_p10 }
   0xd   : > { %p830_p6 = pneg %p971_p5 }
   0xf   : > { %p842_p8 = pnand %p840_p7, %p830_p6 }
  0x11   : > { %p843_p9 = pneg %p842_p8 }
  0x13   : > { %p850_p13 = pnand %p849_p12, %p843_p9 }
  0x15   : > { %853 = shalt.err (!%p850_p13)
}
  0x16   : > { %s898_s15 = smov 128   ;;  %s899_s16 = smov 8  }
  0x17   : > { %799 = dma.hbm_to_vmem [thread:$0]  (!%p971_p5), %s1062_s2, 256, %s243_s7, [#allocation4], %s898_s15, %s898_s15, %s899_s16  }
  0x18   : > { %s865_s19 = scalar_lea.vmem %s259_s12, 2048  ;;  %p873_p7 = scmp.lt.s32.totalorder %s259_s12, %s259_s12 }
  0x19   : > { %p866_p0 = scmp.ne.s32.totalorder %s259_s12, %s865_s19  ;;  %p874_p8 = scmp.lt.s32.totalorder %s865_s19, %s865_s19 }
  0x1b   : > { %p868_p1 = pnand %p866_p0, %p830_p6  ;;  %p875_p10 = por %p874_p8, %p873_p7 }
  0x1d   : > { %p869_p4 = pneg %p868_p1 }
  0x1f   : > { %p876_p9 = pnand %p875_p10, %p869_p4 }
  0x21   : > { %879 = shalt.err (!%p876_p9)
}
  0x22   : > { %802 = dma.hbm_to_vmem [thread:$0]  (!%p971_p5), %s1064_s4, 2048, %s259_s12, [#allocation6], %s898_s15, %s898_s15, %s899_s16  }
  0x23   : > { %297 = sbr.rel (%p962_p2) target bundleno = 918 (0x396), region = 52 }
  0x28   : > { %885 = dma.done.wait (%p803_p3), [#allocation4], 256  }
  0x29   : > { %887 = vsyncadd (%p803_p3), [#allocation4], 4294967040 }
  0x2a   : > { %889 = dma.done.wait (%p803_p3), [#allocation6], 2048  }
  0x2b   : > { %891 = vsyncadd (%p803_p3), [#allocation6], 4294965248  ;;  %p336_p6 = scmp.lt.s32.totalorder %s958_s30, 1  ;;  %v900_v0 = vmov 0   ;;  %v901_v1 = vmov 0.0   ;;  %v364_v3 = vld [vmem:[#allocation3 + $0x8] sm:$0xff]  ;;  %v349_v7 = vlaneseq }
  0x2c   : > { %823 = vset.pattern.permute.xlu0 %v900_v0  ;;  %741 = vmatprep.subr.mxu0 %v901_v1  ;;  %v363_v4 = vld [vmem:[#allocation3] sm:$0xff]  ;;  %vm902_vm0 = vmmov 0   ;;  %v462_v5 = vld [vmem:[#allocation5 + $0x78] sm:$0xff]  ;;  %v460_v8 = vld [vmem:[#allocation5 + $0x68] sm:$0xff]  ;;  %s903_s26 = smov 12   ;;  %vm361_vm2 = vcmask 97280  }
  0x2d   : > { %s1072_s30 = smov (!%p336_p6, %s958_s30), 1  ;;  %748 = vmatprep.subr.mxu1 %v901_v1  ;;  %742 = vmatpush3.msra.mxu0 %v364_v3  ;;  %v461_v6 = vld [vmem:[#allocation5 + $0x70] sm:$0xff]  ;;  %v459_v9 = vld [vmem:[#allocation5 + $0x60] sm:$0xff]  ;;  %v350_v10 = vand.u32 127, %v349_v7  ;;  %v458_v11 = vld [vmem:[#allocation5 + $0x58] sm:$0xff]  ;;  %vm372_vm3 = vcmask 130048  }
  0x2e   : > { %s711_s22 = sshll.u32 %s1072_s30, 3  ;;  %743 = vmatprep.subr.mxu0 %v901_v1  ;;  %745 = vmatprep.mubr.msk.f32.mxu0 %vm902_vm0, %v901_v1  ;;  %v457_v12 = vld [vmem:[#allocation5 + $0x50] sm:$0xff]  ;;  %v456_v14 = vld [vmem:[#allocation5 + $0x48] sm:$0xff]  ;;  %v455_v16 = vld [vmem:[#allocation5 + $0x40] sm:$0xff]  ;;  %s542_s15 = sld [smem:[#allocation2]]  ;;  %vm619_vm4 = vcmask 57344  }
  0x2f   : > { %s343_s25 = scalar_lea.vmem %s1061_s1, %s711_s22  ;;  %744 = vmatpush3.msra.mxu0 %v363_v4  ;;  %780 = vmatprep.mubr.msk.f32.mxu1 %vm902_vm0, %v901_v1  ;;  %v454_v17 = vld [vmem:[#allocation5 + $0x38] sm:$0xff]  ;;  %v453_v18 = vld [vmem:[#allocation5 + $0x30] sm:$0xff]  ;;  %v452_v19 = vld [vmem:[#allocation5 + $0x28] sm:$0xff]  ;;  %s339_s9 = scalar_lea.vmem %s1060_s0, %s711_s22 }
  0x30   : > { %v348_v2 = vld [vmem:[%s343_s25] sm:$0xff]  ;;  %783 = vmatprep.subr.mxu0 %v901_v1  ;;  %749 = vmatpush3.msra.mxu1 %v462_v5  ;;  %v451_v20 = vld [vmem:[#allocation5 + $0x20] sm:$0xff]  ;;  %v450_v21 = vld [vmem:[#allocation5 + $0x18] sm:$0xff]  ;;  %s346_s18 = scalar_lea.vmem %s1068_s8, %s1072_s30 }
  0x31   : > { %352 = vperm.xlu0 %823, %v348_v2   ;;  %750 = vmatprep.subr.mxu1 %v901_v1  ;;  %v347_v22 = vld [vmem:[%s339_s9] sm:$0xff]  ;;  %v448_v26 = vld [vmem:[#allocation5 + $0x8] sm:$0xff]  ;;  %v447_v27 = vld [vmem:[#allocation5] sm:$0xff] }
  0x32   : > { %751 = vmatpush3.msra.mxu1 %v461_v6  ;;  %v449_v25 = vld [vmem:[#allocation5 + $0x10] sm:$0xff] }
  0x33   : > { %752 = vmatprep.subr.mxu1 %v901_v1  ;;  %v714_v28 = vld [vmem:[%s1063_s3] ss:$0 sm:$0xff] }
  0x34   : > { %753 = vmatpush3.msra.mxu1 %v460_v8  ;;  %v716_v33 = vld [vmem:[%s1065_s5] ss:$0 sm:$0xff]  ;;  %v543_v39 = vstv %s542_s15 }
  0x35   : > { %754 = vmatprep.subr.mxu1 %v901_v1  ;;  %v541_v38 = vld [vmem:[%s1066_s6] sm:$0x1] }
  0x36   : > { %755 = vmatpush3.msra.mxu1 %v459_v9 }
  0x37   : > { %756 = vmatprep.subr.mxu1 %v901_v1 }
  0x38   : > { %757 = vmatpush3.msra.mxu1 %v458_v11 }
  0x39   : > { %758 = vmatprep.subr.mxu1 %v901_v1 }
  0x3a   : > { %759 = vmatpush3.msra.mxu1 %v457_v12 }
  0x3b   : > { %760 = vmatprep.subr.mxu1 %v901_v1 }
  0x3c   : > { %761 = vmatpush3.msra.mxu1 %v456_v14 }
  0x3d   : > { %762 = vmatprep.subr.mxu1 %v901_v1 }
  0x3e   : > { %763 = vmatpush3.msra.mxu1 %v455_v16 }
  0x3f   : > { %764 = vmatprep.subr.mxu1 %v901_v1 }
  0x40   : > { %765 = vmatpush3.msra.mxu1 %v454_v17 }
  0x41   : > { %766 = vmatprep.subr.mxu1 %v901_v1 }
  0x42   : > { %767 = vmatpush3.msra.mxu1 %v453_v18 }
  0x43   : > { %768 = vmatprep.subr.mxu1 %v901_v1 }
  0x44   : > { %769 = vmatpush3.msra.mxu1 %v452_v19 }
  0x45   : > { %770 = vmatprep.subr.mxu1 %v901_v1 }
  0x46   : > { %771 = vmatpush3.msra.mxu1 %v451_v20 }
  0x47   : > { %772 = vmatprep.subr.mxu1 %v901_v1 }
  0x48   : > { %773 = vmatpush3.msra.mxu1 %v450_v21 }
  0x49   : > { %774 = vmatprep.subr.mxu1 %v901_v1 }
  0x4a   : > { %775 = vmatpush3.msra.mxu1 %v449_v25 }
  0x4b   : > { %776 = vmatprep.subr.mxu1 %v901_v1 }
  0x4c   : > { %777 = vmatpush3.msra.mxu1 %v448_v26 }
  0x4d   : > { %778 = vmatprep.subr.mxu1 %v901_v1 }
  0x4e   : > { %779 = vmatpush3.msra.mxu1 %v447_v27 }
  0xac   : > { %v353_v13 = vpop.permute.xlu0 %352 }
  0xad   : > { %vm354_vm1 = vcmp.eq.s32.totalorder %v350_v10, %v353_v13 }
  0xae   : > { %v713_v15 = vsel %vm354_vm1, 1.0, %v901_v1 }
  0xaf   : > { %358 = vrot.lane.b32.xlu0 %v713_v15, %s903_s26 }
 0x121   : > { %v359_v23 = vpop.permute.xlu0 %358 }
 0x122   : > { %v362_v24 = vsel %vm361_vm2, %v347_v22, %v359_v23 }
 0x123   : > { %746 = vmatmul.mubr.msk.f32.vlgmr.msra.gmra.mxu0 %vm372_vm3, %v362_v24 }
 0x124   : > { %785 = vmatprep.mubr.msk.f32.mxu0 %vm902_vm0, %v901_v1 }
 0x1e3   : > { %v442_v29 = vpop.f32.mrf.mxu0 }
 0x1e4   : > { %v443_v30 = vadd.f32 %v714_v28, %v442_v29 }
 0x1e5   : > { %v747_v31 = vpop.f32.mrf.mxu0 }
 0x1e6   : > { %v446_v32 = vmax.f32 %v443_v30, 0.0 }
 0x1e8   : > { %781 = vmatmul.mubr.f32.vlgmr.msra.gmra.mxu1 %v446_v32 }
 0x2a8   : > { %v536_v34 = vpop.f32.mrf.mxu1 }
 0x2a9   : > { %v537_v35 = vadd.f32 %v716_v33, %v536_v34 }
 0x2aa   : > { %v782_v36 = vpop.f32.mrf.mxu1 }
 0x2ab   : > { %v540_v37 = vmax.f32 %v537_v35, 0.0 }
 0x2ad   : > { %784 = vmatpush3.xpose.msra.mxu0 %v540_v37 }
 0x2b0   : > { %786 = vmatmul.mubr.f32.vlgmr.msra.gmra.mxu0 %v541_v38 }
 0x370   : > { %v610_v40 = vpop.f32.mrf.mxu0 }
 0x371   : > { %v611_v41 = vadd.f32 %v610_v40, %v543_v39 }
 0x372   : > { %v787_v42 = vpop.f32.mrf.mxu0 }
 0x373   : > { %v614_v43 = vsub.f32 0.0, %v611_v41 }
 0x375   : > { %v615_v44 = vmul.f32 1.442695, %v614_v43 }
 0x377   : > { %824 = vpow2.f32 %v615_v44 }
 0x384   : > { %v825_v45 = vpop.eup %824 }
 0x385   : > { %v617_v46 = vadd.f32 1.0, %v825_v45 }
 0x387   : > { %826 = vrcp.f32 %v617_v46 }
 0x394   : > { %v827_v47 = vpop.eup %826 }
 0x395   : > { %620 = vst.msk [vmem:[%s346_s18] sm:$0x1] %vm619_vm4, %v827_v47 }
 0x396 PF: > { %s21_s29 = sadd.s32 1, %s894_s29  }
 0x397   : > { %p18_p2 = scmp.ge.s32.totalorder %s21_s29, 4  }
 0x399   :  { %20 = sbr.rel (!%p18_p2) target bundleno = 4 (0x4), region = 94 }
 0x39e   :  { %638 = vsyncpa [#allocation4], 1 }
 0x39f   :  { %640 = vsyncpa [#allocation4 + $0x1], 1 }
 0x3a0   :  { %641 = vsyncpa [#allocation6], 1 }

</bundles_post_ra>
